<compile_context>
chip_gen: v7x
topology: tpu7x:2x2x1
jax: 0.10.0
libtpu: 0.0.40
codegen_flags: <defaults>
</compile_context>

<pallas_src>
import jax
import jax.numpy as jnp
from jax.experimental import pallas as pl
from jax.experimental.pallas import tpu as pltpu

HIDDEN = 64          # logical hidden width of the PyTorch module
HIDDEN_PAD = 128     # padded hidden width (full 128-lane MXU face)
MAX_TILE_B = 1024    # batch columns per grid step (lane axis of every activation)


def mlp_kernel(xT_ref, w1_ref, b1_ref, w3_ref, b3_ref, w4_ref, b4_ref,
               w2_ref, b2_ref, o_ref):
    # Transposed layout: every activation is (hidden, TILE_B) with batch on the lanes.
    # xT_ref: (IN, TILE_B) bf16; weights bf16 (already transposed); biases f32 column
    # vectors; o_ref: (1, TILE_B) f32 (lane-dense).
    h = jnp.dot(w1_ref[...], xT_ref[...],
                preferred_element_type=jnp.float32) + b1_ref[...]
    h = jnp.maximum(h, 0.0)                                            # relu(fc1), f32

    h = jnp.dot(w3_ref[...], h.astype(jnp.bfloat16),
                preferred_element_type=jnp.float32) + b3_ref[...]
    h = jnp.maximum(h, 0.0)                                            # relu(fc3)

    h = jnp.dot(w4_ref[...], h.astype(jnp.bfloat16),
                preferred_element_type=jnp.float32) + b4_ref[...]
    h = jnp.maximum(h, 0.0)                                            # relu(fc4)

    z = jnp.dot(w2_ref[...], h.astype(jnp.bfloat16),
                preferred_element_type=jnp.float32) + b2_ref[...]      # (1, TILE_B)
    o_ref[...] = jax.nn.sigmoid(z)                                     # lane-dense store


def _pad_and_cast_params(params):
    """Zero-pad hidden 64->128, transpose weights (batch-on-lanes layout),
    cast weights -> bf16 and biases -> f32."""
    hp = HIDDEN_PAD - HIDDEN
    w1t = jnp.pad(params["w1"], ((0, 0), (0, hp))).T.astype(jnp.bfloat16)   # (128, IN)
    b1t = jnp.pad(params["b1"], ((0, 0), (0, hp))).T.astype(jnp.float32)    # (128, 1)
    w3t = jnp.pad(params["w3"], ((0, hp), (0, hp))).T.astype(jnp.bfloat16)  # (128, 128)
    b3t = jnp.pad(params["b3"], ((0, 0), (0, hp))).T.astype(jnp.float32)    # (128, 1)
    w4t = jnp.pad(params["w4"], ((0, hp), (0, hp))).T.astype(jnp.bfloat16)  # (128, 128)
    b4t = jnp.pad(params["b4"], ((0, 0), (0, hp))).T.astype(jnp.float32)    # (128, 1)
    w2t = jnp.pad(params["w2"], ((0, hp), (0, 0))).T.astype(jnp.bfloat16)   # (1, 128)
    b2 = params["b2"].astype(jnp.float32)                                   # (1, 1)
    return w1t, b1t, w3t, b3t, w4t, b4t, w2t, b2


def _choose_tile_b(B, max_tile=MAX_TILE_B):
    """Tile multiple of 256, capped at max_tile, and small enough that the grid has
    >= 2 steps whenever B allows (v7x: both TensorCores get grid steps under
    dimension_semantics=('parallel',)); the extra step is near-free on 1-TC chips."""
    half = -(-B // 2)                    # ceil(B / 2)
    half = -(-half // 256) * 256         # round up to a multiple of 256
    return int(max(256, min(max_tile, half)))


def mlp_forward(x, params, tile_b=None):
    """x: (B, input_size) f32; params: dict of f32 weights (in,out) and biases (1,out)."""
    B, in_size = x.shape
    if tile_b is None:
        tile_b = _choose_tile_b(B)
    w1t, b1t, w3t, b3t, w4t, b4t, w2t, b2 = _pad_and_cast_params(params)

    nb = pl.cdiv(B, tile_b)
    B_pad = nb * tile_b
    # Cast once, pad batch to a tile multiple, transpose so batch lies on the lane axis.
    xT = jnp.pad(x.astype(jnp.bfloat16).T, ((0, 0), (0, B_pad - B)))   # (IN, B_pad)

    def resident(a):  # weights/biases: full-array block, constant index -> VMEM-resident
        return pl.BlockSpec(a.shape, lambda i: (0, 0))

    out = pl.pallas_call(
        mlp_kernel,
        out_shape=jax.ShapeDtypeStruct((1, B_pad), jnp.float32),
        grid=(nb,),
        in_specs=[
            pl.BlockSpec((in_size, tile_b), lambda i: (0, i)),   # stream x by batch tile
            resident(w1t), resident(b1t),
            resident(w3t), resident(b3t),
            resident(w4t), resident(b4t),
            resident(w2t), resident(b2),
        ],
        out_specs=pl.BlockSpec((1, tile_b), lambda i: (0, i)),   # lane-dense (1, tile_b)
        compiler_params=pltpu.CompilerParams(
            dimension_semantics=("parallel",)),                  # v7x: shard batch over 2 TCs
    )(xT, w1t, b1t, w3t, b3t, w4t, b4t, w2t, b2)

    # Slice back to the logical (B, 1) output (padded batch columns discarded).
    return out[0, :B].reshape(B, 1)


def init_params(key, input_size, hidden=HIDDEN):
    # Deterministic synthetic init (PyTorch-like uniform ranges), not a checkpoint load.
    ks = jax.random.split(key, 8)

    def linear(kw, kb, fan_in, fan_out):
        bound = 1.0 / jnp.sqrt(jnp.float32(fan_in))
        w = jax.random.uniform(kw, (fan_in, fan_out), jnp.float32, -bound, bound)
        b = jax.random.uniform(kb, (1, fan_out), jnp.float32, -bound, bound)
        return w, b

    w1, b1 = linear(ks[0], ks[1], input_size, hidden)   # fc1: input_size -> 64
    w3, b3 = linear(ks[2], ks[3], hidden, hidden)       # fc3: 64 -> 64
    w4, b4 = linear(ks[4], ks[5], hidden, hidden)       # fc4: 64 -> 64
    w2, b2 = linear(ks[6], ks[7], hidden, 1)            # fc2: 64 -> 1
    return dict(w1=w1, b1=b1, w3=w3, b3=b3, w4=w4, b4=b4, w2=w2, b2=b2)


def mlp_reference(x, p):
    # Pure-f32 reference matching the PyTorch module semantics.
    h = jax.nn.relu(x.astype(jnp.float32) @ p["w1"] + p["b1"])
    h = jax.nn.relu(h @ p["w3"] + p["b3"])
    h = jax.nn.relu(h @ p["w4"] + p["b4"])
    return jax.nn.sigmoid(h @ p["w2"] + p["b2"])


if __name__ == "__main__":
    key = jax.random.PRNGKey(0)
    k_x, k_p = jax.random.split(key)

    batch, input_size = 300, 32          # non-multiple of 256 -> exercises padding + 2-step grid
    x = jax.random.normal(k_x, (batch, input_size), dtype=jnp.float32)
    params = init_params(k_p, input_size)

    out = mlp_forward(x, params)
    out = jax.block_until_ready(out)

    ref = mlp_reference(x, params)
    assert out.shape == (batch, 1)
    # bf16 MXU operands (f32 accumulation) -> relaxed tolerance vs. the f32 reference.
    assert jnp.allclose(out, ref, atol=2e-2, rtol=2e-2), float(jnp.max(jnp.abs(out - ref)))

    print("KERNEL_OK")
</pallas_src>

<mosaic_0001>
module attributes {stable_mosaic.version = 11 : i64} {
  func.func @mlp_kernel(%arg0: i32, %arg1: memref<32x256xbf16, #tpu.memory_space<vmem>>, %arg2: memref<128x32xbf16, #tpu.memory_space<vmem>>, %arg3: memref<128x1xf32, #tpu.memory_space<vmem>>, %arg4: memref<128x128xbf16, #tpu.memory_space<vmem>>, %arg5: memref<128x1xf32, #tpu.memory_space<vmem>>, %arg6: memref<128x128xbf16, #tpu.memory_space<vmem>>, %arg7: memref<128x1xf32, #tpu.memory_space<vmem>>, %arg8: memref<1x128xbf16, #tpu.memory_space<vmem>>, %arg9: memref<1x1xf32, #tpu.memory_space<vmem>>, %arg10: memref<1x256xf32, #tpu.memory_space<vmem>>) attributes {dimension_semantics = [#tpu.dimension_semantics<parallel>], iteration_bounds = array<i64: 2>, scalar_prefetch = 0 : i64, scratch_operands = 0 : i64, tpu.core_type = #tpu.core_type<tc>, window_params = [{transform_indices = @transform_0, window_bounds = array<i64: 32, 256>}, {pipeline_mode = #tpu.pipeline_mode<synchronous>, transform_indices = @transform_1, window_bounds = array<i64: 128, 32>}, {pipeline_mode = #tpu.pipeline_mode<synchronous>, transform_indices = @transform_2, window_bounds = array<i64: 128, 1>}, {pipeline_mode = #tpu.pipeline_mode<synchronous>, transform_indices = @transform_3, window_bounds = array<i64: 128, 128>}, {pipeline_mode = #tpu.pipeline_mode<synchronous>, transform_indices = @transform_4, window_bounds = array<i64: 128, 1>}, {pipeline_mode = #tpu.pipeline_mode<synchronous>, transform_indices = @transform_5, window_bounds = array<i64: 128, 128>}, {pipeline_mode = #tpu.pipeline_mode<synchronous>, transform_indices = @transform_6, window_bounds = array<i64: 128, 1>}, {pipeline_mode = #tpu.pipeline_mode<synchronous>, transform_indices = @transform_7, window_bounds = array<i64: 1, 128>}, {pipeline_mode = #tpu.pipeline_mode<synchronous>, transform_indices = @transform_8, window_bounds = array<i64: 1, 1>}, {transform_indices = @transform_9, window_bounds = array<i64: 1, 256>}]} {
    %c0 = arith.constant 0 : index
    %c0_0 = arith.constant 0 : index
    %0 = vector.load %arg2[%c0, %c0_0] : memref<128x32xbf16, #tpu.memory_space<vmem>>, vector<128x32xbf16>
    %c0_1 = arith.constant 0 : index
    %c0_2 = arith.constant 0 : index
    %1 = vector.load %arg1[%c0_1, %c0_2] : memref<32x256xbf16, #tpu.memory_space<vmem>>, vector<32x256xbf16>
    %cst = arith.constant dense<0.000000e+00> : vector<128x256xf32>
    %2 = tpu.matmul %0, %1, %cst {dimension_numbers = #tpu.dot_dimension_numbers<[1], [0], [0], [1], [0, 0, 1, 1], [], []>} : vector<128x32xbf16>, vector<32x256xbf16>, vector<128x256xf32> -> vector<128x256xf32>
    %c0_3 = arith.constant 0 : index
    %c0_4 = arith.constant 0 : index
    %3 = vector.load %arg3[%c0_3, %c0_4] : memref<128x1xf32, #tpu.memory_space<vmem>>, vector<128x1xf32>
    %4 = vector.broadcast %3 : vector<128x1xf32> to vector<128x256xf32>
    %5 = arith.addf %2, %4 : vector<128x256xf32>
    %cst_5 = arith.constant 0.000000e+00 : f32
    %6 = vector.broadcast %cst_5 : f32 to vector<128x256xf32>
    %7 = arith.maximumf %5, %6 : vector<128x256xf32>
    %c0_6 = arith.constant 0 : index
    %c0_7 = arith.constant 0 : index
    %8 = vector.load %arg4[%c0_6, %c0_7] : memref<128x128xbf16, #tpu.memory_space<vmem>>, vector<128x128xbf16>
    %9 = arith.truncf %7 : vector<128x256xf32> to vector<128x256xbf16>
    %cst_8 = arith.constant dense<0.000000e+00> : vector<128x256xf32>
    %10 = tpu.matmul %8, %9, %cst_8 {dimension_numbers = #tpu.dot_dimension_numbers<[1], [0], [0], [1], [0, 0, 1, 1], [], []>} : vector<128x128xbf16>, vector<128x256xbf16>, vector<128x256xf32> -> vector<128x256xf32>
    %c0_9 = arith.constant 0 : index
    %c0_10 = arith.constant 0 : index
    %11 = vector.load %arg5[%c0_9, %c0_10] : memref<128x1xf32, #tpu.memory_space<vmem>>, vector<128x1xf32>
    %12 = vector.broadcast %11 : vector<128x1xf32> to vector<128x256xf32>
    %13 = arith.addf %10, %12 : vector<128x256xf32>
    %cst_11 = arith.constant 0.000000e+00 : f32
    %14 = vector.broadcast %cst_11 : f32 to vector<128x256xf32>
    %15 = arith.maximumf %13, %14 : vector<128x256xf32>
    %c0_12 = arith.constant 0 : index
    %c0_13 = arith.constant 0 : index
    %16 = vector.load %arg6[%c0_12, %c0_13] : memref<128x128xbf16, #tpu.memory_space<vmem>>, vector<128x128xbf16>
    %17 = arith.truncf %15 : vector<128x256xf32> to vector<128x256xbf16>
    %cst_14 = arith.constant dense<0.000000e+00> : vector<128x256xf32>
    %18 = tpu.matmul %16, %17, %cst_14 {dimension_numbers = #tpu.dot_dimension_numbers<[1], [0], [0], [1], [0, 0, 1, 1], [], []>} : vector<128x128xbf16>, vector<128x256xbf16>, vector<128x256xf32> -> vector<128x256xf32>
    %c0_15 = arith.constant 0 : index
    %c0_16 = arith.constant 0 : index
    %19 = vector.load %arg7[%c0_15, %c0_16] : memref<128x1xf32, #tpu.memory_space<vmem>>, vector<128x1xf32>
    %20 = vector.broadcast %19 : vector<128x1xf32> to vector<128x256xf32>
    %21 = arith.addf %18, %20 : vector<128x256xf32>
    %cst_17 = arith.constant 0.000000e+00 : f32
    %22 = vector.broadcast %cst_17 : f32 to vector<128x256xf32>
    %23 = arith.maximumf %21, %22 : vector<128x256xf32>
    %c0_18 = arith.constant 0 : index
    %c0_19 = arith.constant 0 : index
    %24 = vector.load %arg8[%c0_18, %c0_19] : memref<1x128xbf16, #tpu.memory_space<vmem>>, vector<1x128xbf16>
    %25 = arith.truncf %23 : vector<128x256xf32> to vector<128x256xbf16>
    %cst_20 = arith.constant dense<0.000000e+00> : vector<1x256xf32>
    %26 = tpu.matmul %24, %25, %cst_20 {dimension_numbers = #tpu.dot_dimension_numbers<[1], [0], [0], [1], [0, 0, 1, 1], [], []>} : vector<1x128xbf16>, vector<128x256xbf16>, vector<1x256xf32> -> vector<1x256xf32>
    %c0_21 = arith.constant 0 : index
    %c0_22 = arith.constant 0 : index
    %27 = vector.load %arg9[%c0_21, %c0_22] : memref<1x1xf32, #tpu.memory_space<vmem>>, vector<1x1xf32>
    %28 = vector.broadcast %27 : vector<1x1xf32> to vector<1x256xf32>
    %29 = arith.addf %26, %28 : vector<1x256xf32>
    %30 = arith.negf %29 : vector<1x256xf32>
    %31 = math.exp %30 : vector<1x256xf32>
    %cst_23 = arith.constant 1.000000e+00 : f32
    %32 = vector.broadcast %cst_23 : f32 to vector<1x256xf32>
    %33 = arith.addf %32, %31 : vector<1x256xf32>
    %34 = arith.divf %32, %33 : vector<1x256xf32>
    %c0_24 = arith.constant 0 : index
    %c0_25 = arith.constant 0 : index
    %35 = vector.load %arg10[%c0_24, %c0_25] : memref<1x256xf32, #tpu.memory_space<vmem>>, vector<1x256xf32>
    tpu.vector_store %arg10[%c0_24, %c0_25], %34 {strides = array<i32>} : memref<1x256xf32, #tpu.memory_space<vmem>>, vector<1x256xf32>,
    return
  }
  func.func @transform_0(%arg0: i32) -> (i32, i32) {
    %c0_i32 = arith.constant 0 : i32
    %c0_i32_0 = arith.constant 0 : i32
    return %c0_i32, %arg0 : i32, i32
  }
  func.func @transform_1(%arg0: i32) -> (i32, i32) {
    %c0_i32 = arith.constant 0 : i32
    %c0_i32_0 = arith.constant 0 : i32
    %c0_i32_1 = arith.constant 0 : i32
    return %c0_i32, %c0_i32_0 : i32, i32
  }
  func.func @transform_2(%arg0: i32) -> (i32, i32) {
    %c0_i32 = arith.constant 0 : i32
    %c0_i32_0 = arith.constant 0 : i32
    %c0_i32_1 = arith.constant 0 : i32
    return %c0_i32, %c0_i32_0 : i32, i32
  }
  func.func @transform_3(%arg0: i32) -> (i32, i32) {
    %c0_i32 = arith.constant 0 : i32
    %c0_i32_0 = arith.constant 0 : i32
    %c0_i32_1 = arith.constant 0 : i32
    return %c0_i32, %c0_i32_0 : i32, i32
  }
  func.func @transform_4(%arg0: i32) -> (i32, i32) {
    %c0_i32 = arith.constant 0 : i32
    %c0_i32_0 = arith.constant 0 : i32
    %c0_i32_1 = arith.constant 0 : i32
    return %c0_i32, %c0_i32_0 : i32, i32
  }
  func.func @transform_5(%arg0: i32) -> (i32, i32) {
    %c0_i32 = arith.constant 0 : i32
    %c0_i32_0 = arith.constant 0 : i32
    %c0_i32_1 = arith.constant 0 : i32
    return %c0_i32, %c0_i32_0 : i32, i32
  }
  func.func @transform_6(%arg0: i32) -> (i32, i32) {
    %c0_i32 = arith.constant 0 : i32
    %c0_i32_0 = arith.constant 0 : i32
    %c0_i32_1 = arith.constant 0 : i32
    return %c0_i32, %c0_i32_0 : i32, i32
  }
  func.func @transform_7(%arg0: i32) -> (i32, i32) {
    %c0_i32 = arith.constant 0 : i32
    %c0_i32_0 = arith.constant 0 : i32
    %c0_i32_1 = arith.constant 0 : i32
    return %c0_i32, %c0_i32_0 : i32, i32
  }
  func.func @transform_8(%arg0: i32) -> (i32, i32) {
    %c0_i32 = arith.constant 0 : i32
    %c0_i32_0 = arith.constant 0 : i32
    %c0_i32_1 = arith.constant 0 : i32
    return %c0_i32, %c0_i32_0 : i32, i32
  }
  func.func @transform_9(%arg0: i32) -> (i32, i32) {
    %c0_i32 = arith.constant 0 : i32
    %c0_i32_0 = arith.constant 0 : i32
    return %c0_i32, %arg0 : i32, i32
  }
}

</mosaic_0001>

<bundles_post_ra>
// kernel: tpu_custom_call.1
= control target key start
LH: loop header
LB: loop body
LE: loop exit
PB: predicated region body
PF: predicated region fallthrough
CT: control target
= control target key end

     0   :  { %s2205_s0 = inlined_call_operand.vmem [shape: bf16[32,512], index: 0, kind: input, shape index: {}]   ;;  %s2206_s1 = inlined_call_operand.vmem [shape: bf16[128,32], index: 1, kind: input, shape index: {}]   ;;  %s2207_s2 = inlined_call_operand.vmem [shape: f32[128,1], index: 2, kind: input, shape index: {}]   ;;  %s2208_s3 = inlined_call_operand.vmem [shape: bf16[128,128], index: 3, kind: input, shape index: {}]   ;;  %s2209_s4 = inlined_call_operand.vmem [shape: f32[128,1], index: 4, kind: input, shape index: {}]   ;;  %s2210_s5 = inlined_call_operand.vmem [shape: bf16[128,128], index: 5, kind: input, shape index: {}]   ;;  %s2211_s6 = inlined_call_operand.vmem [shape: f32[128,1], index: 6, kind: input, shape index: {}]   ;;  %s2212_s7 = inlined_call_operand.vmem [shape: bf16[1,128], index: 7, kind: input, shape index: {}]   ;;  %s2213_s8 = inlined_call_operand.<no memory space> [shape: f32[1,1], index: 8, kind: input, shape index: {}]   ;;  %s2214_s9 = inlined_call_operand.hbm [shape: f32[1,512], index: 9, kind: output, shape index: {}]  }
   0x1   :  { %v14_v0 = vstv %s2213_s8 }
   0x2   :  { %15 = vst [vmem:[#allocation2] sm:$0x1] %v14_v0 }
   0x3   :  { %16 = vsyncpa [#allocation5], 0 }
   0x4   :  { %18 = vsyncpa [#allocation5 + $0x1], 0  ;;  %s1813_s11 = smov 0   ;;  %s1815_s12 = smov 0  }
   0x5   :  { %s1817_s13 = smov 0   ;;  %s1819_s14 = smov 0  }
   0x6 LB: > { %s1553_s8 = sadd.s32 4294967295, %s1755_s14   ;;  %s1554_s15 = sadd.s32 4294967294, %s1755_s14   ;;  %s1755_s14 = sphi %s1819_s14, %s2220_s14   ;;  %s1751_s13 = sphi %s1817_s13, %s2219_s13   ;;  %s1747_s12 = sphi %s1815_s12, %s2218_s12   ;;  %s1743_s11 = sphi %s1813_s11, %s2217_s11  }
   0x7   : > { %s1836_s16 = sadd.s32 1, %s1755_s14   ;;  %s31_s17 = sadd.s32 1, %s1751_s13 }
   0x8   : > { %s28_s18 = ssub.s32 %s1755_s14, %s1836_s16  ;;  %p38_p0 = scmp.ne.s32.totalorder %s1751_s13, %s1747_s12 }
   0x9   : > { %p29_p1 = scmp.eq.s32.totalorder %s28_s18, 0  ;;  %p39_p2 = scmp.eq.s32.totalorder %s1755_s14, 0 }
   0xa   : > { %p236_p3 = scmp.eq.s32.totalorder %s1553_s8, 1  ;;  %p241_p4 = scmp.ne.s32.totalorder %s1747_s12, %s1743_s11 }
   0xb   : > { %s1849_s19 = scalar_select %p29_p1, %s1751_s13, %s31_s17  }
   0xc   : > { %p40_p5 = por %p39_p2, %p38_p0  ;;  %p1851_p6 = por %p236_p3, %p38_p0 }
   0xd   : > { %p242_p7 = scmp.eq.s32.totalorder %s1554_s15, 1  ;;  %p1556_p9 = scmp.ge.s32.totalorder %s1755_s14, 2 }
   0xf   : > { %p1855_p8 = por %p242_p7, %p241_p4  ;;  %282 = sbr.rel (%p1556_p9) target bundleno = 29 (0x1d), region = 48 }
  0x16   : > { %285 = sbr.rel (!%p40_p5) target bundleno = 29 (0x1d), region = 52  ;;  %s287_s22 = sand.u32 (%p40_p5), 1, %s1751_s13  }
  0x17   : > { %s1606_s23 = sshll.u32 (%p40_p5), %s1755_s14, 3  ;;  %s1557_s24 = sshll.u32 (%p40_p5), %s287_s22, 5 }
  0x18   : > { %s292_s27 = scalar_lea.vmem (%p40_p5), %s2205_s0, %s1606_s23  ;;  %s289_s28 = scalar_lea.vmem (%p40_p5), [#allocation3], %s1557_s24 }
  0x19   : > { %v326_v1 = vld [vmem:[%s292_s27] sm:$0xff] (%p40_p5)  ;;  %v328_v2 = vld [vmem:[%s292_s27 + $0x10] sm:$0xff] (%p40_p5) }
  0x1a   : > { %v330_v3 = vld [vmem:[%s292_s27 + $0x20] sm:$0xff] (%p40_p5)  ;;  %327 = vst [vmem:[%s289_s28] sm:$0xff] (%p40_p5), %v326_v1  ;;  %329 = vst [vmem:[%s289_s28 + $0x8] sm:$0xff] (%p40_p5), %v328_v2  ;;  %v332_v4 = vld [vmem:[%s292_s27 + $0x30] sm:$0xff] (%p40_p5) }
  0x1b   : > { %331 = vst [vmem:[%s289_s28 + $0x10] sm:$0xff] (%p40_p5), %v330_v3  ;;  %333 = vst [vmem:[%s289_s28 + $0x18] sm:$0xff] (%p40_p5), %v332_v4 }
  0x1d PF: > { %p1560_p10 = scmp.ge.s32.totalorder %s1755_s14, 1  ;;  %p338_p11 = scmp.lt.s32.totalorder %s1755_s14, 3 }
  0x1f   : > { %p339_p12 = pnand %p1560_p10, %p338_p11 }
  0x20   : > { %s1870_s29 = sand.u32 (!%p339_p12), 1, %s1747_s12   ;;  %v403_v5 = vld [vmem:[%s2207_s2] sm:$0xff] (!%p339_p12)  ;;  %v1757_v6 = vmov (!%p339_p12), 0   ;;  %v404_v10 = vld [vmem:[%s2207_s2 + $0x8] sm:$0xff] (!%p339_p12)  ;;  %v405_v11 = vld [vmem:[%s2207_s2 + $0x10] sm:$0xff] (!%p339_p12)  ;;  %vm559_vm0 = vcmask (!%p339_p12), 261120  }
  0x21   : > { %342 = sbr.rel (%p339_p12) target bundleno = 1132 (0x46c), region = 90  ;;  %s1561_s15 = sshll.u32 (!%p339_p12), %s1870_s29, 5  ;;  %1653 = vset.pattern.permute.xlu0 (!%p339_p12), %v1757_v6  ;;  %616 = vmatprep.mubr.bf16.mxu0 (!%p339_p12), %v1757_v6  ;;  %v1661_v13 = vld [vmem:[%s2206_s1] sm:$0xff] (!%p339_p12)   ;;  %v406_v16 = vld [vmem:[%s2207_s2 + $0x18] sm:$0xff] (!%p339_p12)  ;;  %v409_v17 = vld [vmem:[%s2207_s2 + $0x30] sm:$0xff] (!%p339_p12) }
  0x22   : > { %656 = vmatprep.mubr.bf16.mxu1 (!%p339_p12), %v1757_v6  ;;  %421 = vperm.xlu0 (!%p339_p12), %1653, %v403_v5   ;;  %s347_s17 = scalar_lea.vmem (!%p339_p12), [#allocation3], %s1561_s15  ;;  %v1662_v14 = vld [vmem:[%s2206_s1 + $0x20] sm:$0xff] (!%p339_p12)   ;;  %v408_v18 = vld [vmem:[%s2207_s2 + $0x28] sm:$0xff] (!%p339_p12)  ;;  %v410_v22 = vld [vmem:[%s2207_s2 + $0x38] sm:$0xff] (!%p339_p12)  ;;  %s1607_s22 = sshll.u32 (!%p339_p12), %s1553_s8, 5 }
  0x23   : > { %v1655_v7 = vld [vmem:[%s347_s17 + $0x4] ss:$8 sps:$4 sm:$0xff] (!%p339_p12)   ;;  %1654 = vset.pattern.permute.xlu1 (!%p339_p12), %v1757_v6  ;;  %v1657_v8 = vld [vmem:[%s347_s17] ss:$8 sps:$4 sm:$0xff] (!%p339_p12)   ;;  %v1658_v9 = vld [vmem:[%s347_s17 + $0x14] ss:$8 sps:$4 sm:$0xff] (!%p339_p12)   ;;  %s2161_s27 = scalar_lea.hbm (!%p339_p12), %s2214_s9, %s1607_s22 }
  0x24   : > { %584 = vmatprep.subr.bf16.mxu0 (!%p339_p12), %v1655_v7  ;;  %1608 = vmatprep.subr.bf16.mxu1 (!%p339_p12), %v1655_v7  ;;  %v1660_v12 = vld [vmem:[%s347_s17 + $0x10] ss:$8 sps:$4 sm:$0xff] (!%p339_p12)   ;;  %v407_v15 = vld [vmem:[%s2207_s2 + $0x20] sm:$0xff] (!%p339_p12)  ;;  %v1663_v19 = vld [vmem:[%s2206_s1 + $0x8] sm:$0xff] (!%p339_p12)   ;;  %s1562_s17 = sshll.u32 (!%p339_p12), %s1870_s29, 1  ;;  %s1475_s28 = scalar_lea.sflag (!%p339_p12), [#allocation5], %s1870_s29 }
  0x25   : > { %585 = vmatpush1.bf16.msra.mxu0 (!%p339_p12), %v1657_v8  ;;  %1610 = vmatpush1.bf16.msra.mxu1 (!%p339_p12), %v1657_v8  ;;  %v1664_v20 = vld [vmem:[%s2206_s1 + $0x28] sm:$0xff] (!%p339_p12)   ;;  %v411_v21 = vld [vmem:[%s2207_s2 + $0x40] sm:$0xff] (!%p339_p12)  ;;  %v413_v23 = vld [vmem:[%s2207_s2 + $0x50] sm:$0xff] (!%p339_p12)  ;;  %s379_s23 = scalar_lea.vmem (!%p339_p12), [#allocation4], %s1562_s17  ;;  %s1759_s8 = smov (!%p339_p12), [#allocation4]  }
  0x26   : > { %586 = vmatprep.subr.bf16.mxu0 (!%p339_p12), %v1658_v9  ;;  %1609 = vmatprep.subr.bf16.mxu1 (!%p339_p12), %v1658_v9  ;;  %v412_v24 = vld [vmem:[%s2207_s2 + $0x48] sm:$0xff] (!%p339_p12)  ;;  %v1665_v25 = vld [vmem:[%s2206_s1 + $0x10] sm:$0xff] (!%p339_p12)   ;;  %v415_v27 = vld [vmem:[%s2207_s2 + $0x60] sm:$0xff] (!%p339_p12)  ;;  %s1489_s24 = sshll.u32 (!%p339_p12), %s379_s23, 4  ;;  %s1697_s10 = sshll.u32 (!%p339_p12), %s1759_s8, 4  ;;  %s2163_s24 = int_to_ptr.vmem [resolvable:$true] %s1489_s24  ;;  %s1698_s10 = int_to_ptr.vmem [resolvable:$false] %s1697_s10 }
  0x27   : > { %426 = vperm.xlu0 (!%p339_p12), %1653, %v404_v10   ;;  %431 = vperm.xlu1 (!%p339_p12), %1654, %v405_v11   ;;  %v1666_v26 = vld [vmem:[%s2206_s1 + $0x30] sm:$0xff] (!%p339_p12)   ;;  %v414_v28 = vld [vmem:[%s2207_s2 + $0x58] sm:$0xff] (!%p339_p12)  ;;  %v416_v30 = vld [vmem:[%s2207_s2 + $0x68] sm:$0xff] (!%p339_p12)  ;;  %s1693_s30 = scalar_lea.vmem (!%p339_p12), %s2163_s24, 32  ;;  %s1699_s15 = scalar_lea.vmem (!%p339_p12), %s1698_s10, 64 }
  0x28   : > { %v417_v29 = vld [vmem:[%s2207_s2 + $0x70] sm:$0xff]  ;;  %v1667_v31 = vld [vmem:[%s2206_s1 + $0x18] sm:$0xff]   ;;  %v761_v33 = vld [vmem:[%s2209_s4] sm:$0xff]  ;;  %p1694_p13 = scmp.ne.s32.totalorder %s2163_s24, %s1693_s30  ;;  %p1700_p2 = scmp.lt.s32.totalorder %s2163_s24, %s1698_s10 }
  0x29   : > { %587 = vmatpush1.bf16.msra.mxu0 %v1660_v12  ;;  %1611 = vmatpush1.bf16.msra.mxu1 %v1660_v12  ;;  %v1668_v32 = vld [vmem:[%s2206_s1 + $0x38] sm:$0xff]   ;;  %v763_v35 = vld [vmem:[%s2209_s4 + $0x10] sm:$0xff]  ;;  %v762_v36 = vld [vmem:[%s2209_s4 + $0x8] sm:$0xff]  ;;  %p1701_p3 = scmp.lt.s32.totalorder %s1699_s15, %s1693_s30 }
  0x2a   : > { %v418_v34 = vld [vmem:[%s2207_s2 + $0x78] sm:$0xff]  ;;  %v765_v37 = vld [vmem:[%s2209_s4 + $0x20] sm:$0xff]  ;;  %v767_v39 = vld [vmem:[%s2209_s4 + $0x30] sm:$0xff]  ;;  %p1695_p0 = pnand %p1694_p13, %p1851_p6 }
  0x2b   : > { %441 = vperm.xlu0 %1653, %v407_v15   ;;  %436 = vperm.xlu1 %1654, %v406_v16   ;;  %v764_v38 = vld [vmem:[%s2209_s4 + $0x18] sm:$0xff]  ;;  %v766_v40 = vld [vmem:[%s2209_s4 + $0x28] sm:$0xff]  ;;  %v769_v41 = vld [vmem:[%s2209_s4 + $0x40] sm:$0xff]  ;;  %p1702_p4 = por %p1701_p3, %p1700_p2 }
  0x2c   : > { %1575 = vmatmul.mubr.msk.bf16.vlgmr.msra.gmra.mrb[0].mxu0 %vm559_vm0, %v1661_v13  ;;  %1579 = vmatmul.mubr.msk.bf16.vlgmr.msra.gmra.mrb[0].mxu1 %vm559_vm0, %v1662_v14  ;;  %v768_v42 = vld [vmem:[%s2209_s4 + $0x38] sm:$0xff]  ;;  %v771_v43 = vld [vmem:[%s2209_s4 + $0x50] sm:$0xff]  ;;  %v770_v44 = vld [vmem:[%s2209_s4 + $0x48] sm:$0xff]  ;;  %p1696_p1 = pneg %p1695_p0 }
  0x2d   : > { %626 = vmatprep.mubr.bf16.mxu0 %v1757_v6  ;;  %666 = vmatprep.mubr.bf16.mxu1 %v1757_v6  ;;  %v773_v45 = vld [vmem:[%s2209_s4 + $0x60] sm:$0xff]  ;;  %v772_v46 = vld [vmem:[%s2209_s4 + $0x58] sm:$0xff]  ;;  %v775_v47 = vld [vmem:[%s2209_s4 + $0x70] sm:$0xff] }
  0x2e   : > { %v774_v48 = vld [vmem:[%s2209_s4 + $0x68] sm:$0xff]  ;;  %v1082_v49 = vld [vmem:[%s2211_s6] sm:$0xff]  ;;  %v776_v50 = vld [vmem:[%s2209_s4 + $0x78] sm:$0xff]  ;;  %p1703_p5 = pnand %p1702_p4, %p1696_p1 }
  0x2f   : > { %451 = vperm.xlu0 %1653, %v409_v17   ;;  %446 = vperm.xlu1 %1654, %v408_v18   ;;  %v1084_v51 = vld [vmem:[%s2211_s6 + $0x10] sm:$0xff]  ;;  %v1083_v52 = vld [vmem:[%s2211_s6 + $0x8] sm:$0xff]  ;;  %v1086_v53 = vld [vmem:[%s2211_s6 + $0x20] sm:$0xff] }
  0x30   : > { %v1085_v54 = vld [vmem:[%s2211_s6 + $0x18] sm:$0xff]  ;;  %v1088_v55 = vld [vmem:[%s2211_s6 + $0x30] sm:$0xff]  ;;  %v1087_v56 = vld [vmem:[%s2211_s6 + $0x28] sm:$0xff] }
  0x31   : > { %v1090_v57 = vld [vmem:[%s2211_s6 + $0x40] sm:$0xff]  ;;  %v1089_v58 = vld [vmem:[%s2211_s6 + $0x38] sm:$0xff]  ;;  %v1092_v59 = vld [vmem:[%s2211_s6 + $0x50] sm:$0xff] }
  0x32   : > { %v1091_v60 = vld [vmem:[%s2211_s6 + $0x48] sm:$0xff]  ;;  %v1094_v61 = vld [vmem:[%s2211_s6 + $0x60] sm:$0xff]  ;;  %v1093_v62 = vld [vmem:[%s2211_s6 + $0x58] sm:$0xff] }
  0x33   : > { %461 = vperm.xlu0 %1653, %v411_v21   ;;  %456 = vperm.xlu1 %1654, %v410_v22   ;;  %v1096_v63 = vld [vmem:[%s2211_s6 + $0x70] sm:$0xff]  ;;  %v1095_v0 = vld [vmem:[%s2211_s6 + $0x68] sm:$0xff]  ;;  %v1388_v1 = vld [vmem:[#allocation2] sm:$0x1] }
  0x34   : > { %1576 = vmatmul.mubr.msk.bf16.gmra.mrb[4].mxu0 %vm559_vm0, %v1663_v19  ;;  %1580 = vmatmul.mubr.msk.bf16.gmra.mrb[4].mxu1 %vm559_vm0, %v1664_v20  ;;  %v1097_v2 = vld [vmem:[%s2211_s6 + $0x78] sm:$0xff] }
  0x35   : > { %636 = vmatprep.mubr.bf16.mxu0 %v1757_v6  ;;  %676 = vmatprep.mubr.bf16.mxu1 %v1757_v6 }
  0x37   : > { %471 = vperm.xlu0 %1653, %v413_v23   ;;  %466 = vperm.xlu1 %1654, %v412_v24  }
  0x3b   : > { %481 = vperm.xlu0 %1653, %v415_v27   ;;  %476 = vperm.xlu1 %1654, %v414_v28  }
  0x3c   : > { %1577 = vmatmul.mubr.msk.bf16.gmra.mrb[8].mxu0 %vm559_vm0, %v1665_v25  ;;  %1581 = vmatmul.mubr.msk.bf16.gmra.mrb[8].mxu1 %vm559_vm0, %v1666_v26 }
  0x3d   : > { %646 = vmatprep.mubr.bf16.mxu0 %v1757_v6  ;;  %686 = vmatprep.mubr.bf16.mxu1 %v1757_v6 }
  0x3f   : > { %491 = vperm.xlu0 %1653, %v417_v29   ;;  %486 = vperm.xlu1 %1654, %v416_v30  }
  0x43   : > { %779 = vperm.xlu0 %1653, %v761_v33   ;;  %496 = vperm.xlu1 %1654, %v418_v34  }
  0x44   : > { %1578 = vmatmul.mubr.msk.bf16.gmra.mrb[12].mxu0 %vm559_vm0, %v1667_v31  ;;  %1582 = vmatmul.mubr.msk.bf16.gmra.mrb[12].mxu1 %vm559_vm0, %v1668_v32 }
  0x45   : > { %937 = vmatprep.mubr.bf16.mxu1 %v1757_v6  ;;  %1258 = vmatprep.mubr.bf16.mxu0 %v1757_v6 }
  0x47   : > { %789 = vperm.xlu0 %1653, %v763_v35   ;;  %784 = vperm.xlu1 %1654, %v762_v36  }
  0x4b   : > { %799 = vperm.xlu0 %1653, %v765_v37   ;;  %794 = vperm.xlu1 %1654, %v764_v38  }
  0x4f   : > { %809 = vperm.xlu0 %1653, %v767_v39   ;;  %804 = vperm.xlu1 %1654, %v766_v40  }
  0x53   : > { %819 = vperm.xlu0 %1653, %v769_v41   ;;  %814 = vperm.xlu1 %1654, %v768_v42  }
  0x57   : > { %829 = vperm.xlu0 %1653, %v771_v43   ;;  %824 = vperm.xlu1 %1654, %v770_v44  }
  0x5b   : > { %839 = vperm.xlu0 %1653, %v773_v45   ;;  %834 = vperm.xlu1 %1654, %v772_v46  }
  0x5f   : > { %849 = vperm.xlu0 %1653, %v775_v47   ;;  %844 = vperm.xlu1 %1654, %v774_v48  }
  0x63   : > { %1100 = vperm.xlu0 %1653, %v1082_v49   ;;  %854 = vperm.xlu1 %1654, %v776_v50  }
  0x67   : > { %1110 = vperm.xlu0 %1653, %v1084_v51   ;;  %1105 = vperm.xlu1 %1654, %v1083_v52  }
  0x6b   : > { %1120 = vperm.xlu0 %1653, %v1086_v53   ;;  %1115 = vperm.xlu1 %1654, %v1085_v54  }
  0x6f   : > { %1130 = vperm.xlu0 %1653, %v1088_v55   ;;  %1125 = vperm.xlu1 %1654, %v1087_v56  }
  0x73   : > { %1140 = vperm.xlu0 %1653, %v1090_v57   ;;  %1135 = vperm.xlu1 %1654, %v1089_v58  }
  0x77   : > { %1150 = vperm.xlu0 %1653, %v1092_v59   ;;  %1145 = vperm.xlu1 %1654, %v1091_v60  }
  0x7b   : > { %1160 = vperm.xlu0 %1653, %v1094_v61   ;;  %1155 = vperm.xlu1 %1654, %v1093_v62  }
  0x7f   : > { %1170 = vperm.xlu0 %1653, %v1096_v63   ;;  %1165 = vperm.xlu1 %1654, %v1095_v0  }
  0x83   : > { %1391 = vperm.xlu0 %1653, %v1388_v1   ;;  %1175 = vperm.xlu1 %1654, %v1097_v2  }
  0xa1   : > { %v422_v3 = vpop.permute.xlu0 %421 }
  0xa6   : > { %v432_v4 = vpop.permute.xlu1 %431  ;;  %v427_v5 = vpop.permute.xlu0 %426 }
  0xaa   : > { %v437_v7 = vpop.permute.xlu1 %436  ;;  %v2061_v8 = vpop.permute.xlu0 %441 }
  0xae   : > { %v2063_v9 = vpop.permute.xlu1 %446  ;;  %v2065_v10 = vpop.permute.xlu0 %451 }
  0xb2   : > { %v2067_v11 = vpop.permute.xlu1 %456  ;;  %v462_v12 = vpop.permute.xlu0 %461 }
  0xb6   : > { %v467_v13 = vpop.permute.xlu1 %466  ;;  %v472_v38 = vpop.permute.xlu0 %471 }
  0xba   : > { %v477_v39 = vpop.permute.xlu1 %476 }
  0xff   : > { %v618_v14 = vpop.f32.mrb[0].mxu0  ;;  %v658_v15 = vpop.f32.mrb[0].mxu1 }
 0x100   : > { %v619_v16 = vadd.f32 %v618_v14, %v422_v3  ;;  %v620_v17 = vpop.f32.mrb[1].mxu0  ;;  %v659_v18 = vadd.f32 %v658_v15, %v462_v12  ;;  %v660_v19 = vpop.f32.mrb[1].mxu1 }
 0x101   : > { %v621_v20 = vadd.f32 %v620_v17, %v422_v3  ;;  %v622_v21 = vpop.f32.mrb[2].mxu0  ;;  %v661_v22 = vadd.f32 %v660_v19, %v462_v12  ;;  %v662_v23 = vpop.f32.mrb[2].mxu1 }
 0x102   : > { %v623_v24 = vadd.f32 %v622_v21, %v427_v5  ;;  %v624_v25 = vpop.f32.mrb[3].mxu0  ;;  %v713_v26 = vmax.f32 %v659_v18, 0.0  ;;  %v663_v27 = vadd.f32 %v662_v23, %v467_v13  ;;  %v664_v28 = vpop.f32.mrb[3].mxu1  ;;  %v697_v32 = vmax.f32 %v619_v16, 0.0 }
 0x103   : > { %v625_v29 = vadd.f32 %v624_v25, %v427_v5  ;;  %v714_v30 = vmax.f32 %v661_v22, 0.0  ;;  %v665_v31 = vadd.f32 %v664_v28, %v467_v13  ;;  %v698_v35 = vmax.f32 %v621_v20, 0.0  ;;  %v487_v5 = vpop.permute.xlu1 %486 }
 0x104   : > { %v699_v33 = vmax.f32 %v623_v24, 0.0  ;;  %v715_v34 = vmax.f32 %v663_v27, 0.0 }
 0x105   : > { %v700_v36 = vmax.f32 %v625_v29, 0.0  ;;  %v716_v37 = vmax.f32 %v665_v31, 0.0 }
 0x106   : > { %v745_v40 = vpack.c.bf16 %v699_v33, %v697_v32  ;;  %v2069_v41 = vpack.c.bf16 %v715_v34, %v713_v26 }
 0x107   : > { %v746_v42 = vpack.c.bf16 %v700_v36, %v698_v35  ;;  %v2071_v43 = vpack.c.bf16 %v716_v37, %v714_v30  ;;  %v628_v44 = vpop.f32.mrb[4].mxu0  ;;  %v668_v45 = vpop.f32.mrb[4].mxu1 }
 0x108   : > { %v629_v46 = vadd.f32 %v628_v44, %v432_v4  ;;  %v669_v47 = vadd.f32 %v668_v45, %v472_v38  ;;  %v630_v48 = vpop.f32.mrb[5].mxu0  ;;  %v670_v49 = vpop.f32.mrb[5].mxu1 }
 0x109   : > { %v631_v50 = vadd.f32 %v630_v48, %v432_v4  ;;  %v671_v51 = vadd.f32 %v670_v49, %v472_v38  ;;  %v632_v52 = vpop.f32.mrb[6].mxu0  ;;  %v672_v53 = vpop.f32.mrb[6].mxu1  ;;  %905 = vmatprep.subr.bf16.mxu1 %v746_v42 }
 0x10a   : > { %v717_v54 = vmax.f32 %v669_v47, 0.0  ;;  %v633_v55 = vadd.f32 %v632_v52, %v437_v7  ;;  %v673_v56 = vadd.f32 %v672_v53, %v477_v39  ;;  %v634_v57 = vpop.f32.mrb[7].mxu0  ;;  %v674_v58 = vpop.f32.mrb[7].mxu1  ;;  %906 = vmatpush1.bf16.msra.mxu1 %v745_v40  ;;  %v701_v62 = vmax.f32 %v629_v46, 0.0 }
 0x10b   : > { %v718_v59 = vmax.f32 %v671_v51, 0.0  ;;  %v635_v60 = vadd.f32 %v634_v57, %v437_v7  ;;  %v675_v61 = vadd.f32 %v674_v58, %v477_v39  ;;  %v702_v1 = vmax.f32 %v631_v50, 0.0  ;;  %v482_v4 = vpop.permute.xlu0 %481  ;;  %v497_v39 = vpop.permute.xlu1 %496 }
 0x10c   : > { %v703_v63 = vmax.f32 %v633_v55, 0.0  ;;  %v719_v0 = vmax.f32 %v673_v56, 0.0 }
 0x10d   : > { %v704_v2 = vmax.f32 %v635_v60, 0.0  ;;  %v720_v3 = vmax.f32 %v675_v61, 0.0 }
 0x10e   : > { %v747_v12 = vpack.c.bf16 %v703_v63, %v701_v62  ;;  %v2073_v13 = vpack.c.bf16 %v719_v0, %v717_v54 }
 0x10f   : > { %v748_v14 = vpack.c.bf16 %v704_v2, %v702_v1  ;;  %v2075_v15 = vpack.c.bf16 %v720_v3, %v718_v59  ;;  %v638_v16 = vpop.f32.mrb[8].mxu0  ;;  %v678_v17 = vpop.f32.mrb[8].mxu1 }
 0x110   : > { %v639_v18 = vadd.f32 %v638_v16, %v2061_v8  ;;  %v679_v7 = vadd.f32 %v678_v17, %v482_v4  ;;  %v640_v19 = vpop.f32.mrb[9].mxu0  ;;  %v680_v20 = vpop.f32.mrb[9].mxu1  ;;  %v1674_v16 = vld [vmem:[%s2208_s3 + $0x28] sm:$0xff]   ;;  %v1675_v17 = vld [vmem:[%s2208_s3 + $0x30] sm:$0xff]  }
 0x111   : > { %v641_v21 = vadd.f32 %v640_v19, %v2061_v8  ;;  %v681_v22 = vadd.f32 %v680_v20, %v482_v4  ;;  %v642_v23 = vpop.f32.mrb[10].mxu0  ;;  %v682_v24 = vpop.f32.mrb[10].mxu1  ;;  %907 = vmatprep.subr.bf16.mxu1 %v748_v14 }
 0x112   : > { %v643_v25 = vadd.f32 %v642_v23, %v2063_v9  ;;  %v683_v26 = vadd.f32 %v682_v24, %v487_v5  ;;  %v644_v27 = vpop.f32.mrb[11].mxu0  ;;  %v684_v28 = vpop.f32.mrb[11].mxu1  ;;  %908 = vmatpush1.bf16.msra.mxu1 %v747_v12  ;;  %v705_v31 = vmax.f32 %v639_v18, 0.0  ;;  %v721_v32 = vmax.f32 %v679_v7, 0.0  ;;  %v1676_v18 = vld [vmem:[%s2208_s3 + $0x38] sm:$0xff]  }
 0x113   : > { %v645_v29 = vadd.f32 %v644_v27, %v2063_v9  ;;  %v685_v30 = vadd.f32 %v684_v28, %v487_v5  ;;  %v706_v35 = vmax.f32 %v641_v21, 0.0  ;;  %v722_v36 = vmax.f32 %v681_v22, 0.0  ;;  %v492_v38 = vpop.permute.xlu0 %491  ;;  %v785_v22 = vpop.permute.xlu1 %784 }
 0x114   : > { %v707_v33 = vmax.f32 %v643_v25, 0.0  ;;  %v723_v34 = vmax.f32 %v683_v26, 0.0 }
 0x115   : > { %v708_v8 = vmax.f32 %v645_v29, 0.0  ;;  %v724_v37 = vmax.f32 %v685_v30, 0.0 }
 0x116   : > { %v749_v40 = vpack.c.bf16 %v707_v33, %v705_v31  ;;  %v757_v42 = vpack.c.bf16 %v723_v34, %v721_v32 }
 0x117   : > { %v750_v44 = vpack.c.bf16 %v708_v8, %v706_v35  ;;  %v758_v45 = vpack.c.bf16 %v724_v37, %v722_v36  ;;  %v648_v46 = vpop.f32.mrb[12].mxu0  ;;  %v688_v47 = vpop.f32.mrb[12].mxu1 }
 0x118   : > { %v649_v48 = vadd.f32 %v648_v46, %v2065_v10  ;;  %v689_v9 = vadd.f32 %v688_v47, %v492_v38  ;;  %v650_v49 = vpop.f32.mrb[13].mxu0  ;;  %v690_v50 = vpop.f32.mrb[13].mxu1 }
 0x119   : > { %v651_v51 = vadd.f32 %v650_v49, %v2065_v10  ;;  %v691_v52 = vadd.f32 %v690_v50, %v492_v38  ;;  %v652_v53 = vpop.f32.mrb[14].mxu0  ;;  %v692_v54 = vpop.f32.mrb[14].mxu1  ;;  %909 = vmatprep.subr.bf16.mxu1 %v750_v44 }
 0x11a   : > { %v653_v55 = vadd.f32 %v652_v53, %v2067_v11  ;;  %v693_v56 = vadd.f32 %v692_v54, %v497_v39  ;;  %v654_v57 = vpop.f32.mrb[15].mxu0  ;;  %v694_v58 = vpop.f32.mrb[15].mxu1  ;;  %910 = vmatpush1.bf16.msra.mxu1 %v749_v40  ;;  %v709_v61 = vmax.f32 %v649_v48, 0.0  ;;  %v725_v62 = vmax.f32 %v689_v9, 0.0 }
 0x11b   : > { %v655_v59 = vadd.f32 %v654_v57, %v2067_v11  ;;  %v695_v60 = vadd.f32 %v694_v58, %v497_v39  ;;  %v710_v1 = vmax.f32 %v651_v51, 0.0  ;;  %v726_v2 = vmax.f32 %v691_v52, 0.0  ;;  %v1669_v11 = vld [vmem:[%s2208_s3] sm:$0xff]   ;;  %v780_v7 = vpop.permute.xlu0 %779  ;;  %v795_v37 = vpop.permute.xlu1 %794 }
 0x11c   : > { %v711_v63 = vmax.f32 %v653_v55, 0.0  ;;  %v727_v0 = vmax.f32 %v693_v56, 0.0 }
 0x11d   : > { %v712_v10 = vmax.f32 %v655_v59, 0.0  ;;  %v728_v3 = vmax.f32 %v695_v60, 0.0 }
 0x11e   : > { %v751_v4 = vpack.c.bf16 %v711_v63, %v709_v61  ;;  %v759_v5 = vpack.c.bf16 %v727_v0, %v725_v62 }
 0x11f   : > { %v752_v12 = vpack.c.bf16 %v712_v10, %v710_v1  ;;  %v760_v14 = vpack.c.bf16 %v728_v3, %v726_v2  ;;  %v790_v33 = vpop.permute.xlu0 %789  ;;  %v805_v54 = vpop.permute.xlu1 %804 }
 0x121   : > { %911 = vmatprep.subr.bf16.mxu1 %v752_v12 }
 0x122   : > { %912 = vmatpush1.bf16.msra.mxu1 %v751_v4 }
 0x123   : > { %913 = vmatprep.subr.bf16.mxu1 %v2071_v43  ;;  %v1670_v43 = vld [vmem:[%s2208_s3 + $0x8] sm:$0xff]   ;;  %v800_v49 = vpop.permute.xlu0 %799 }
 0x126   : > { %914 = vmatpush1.bf16.msra.mxu1 %v2069_v41  ;;  %v1671_v41 = vld [vmem:[%s2208_s3 + $0x10] sm:$0xff]  }
 0x127   : > { %915 = vmatprep.subr.bf16.mxu1 %v2075_v15  ;;  %v1673_v15 = vld [vmem:[%s2208_s3 + $0x20] sm:$0xff]   ;;  %v810_v1 = vpop.permute.xlu0 %809 }
 0x12a   : > { %916 = vmatpush1.bf16.msra.mxu1 %v2073_v13  ;;  %v1672_v13 = vld [vmem:[%s2208_s3 + $0x18] sm:$0xff]  }
 0x12b   : > { %917 = vmatprep.subr.bf16.mxu1 %v758_v45 }
 0x12e   : > { %918 = vmatpush1.bf16.msra.mxu1 %v757_v42 }
 0x12f   : > { %919 = vmatprep.subr.bf16.mxu1 %v760_v14 }
 0x132   : > { %920 = vmatpush1.bf16.msra.mxu1 %v759_v5  ;;  %v815_v5 = vpop.permute.xlu1 %814 }
 0x135   : > { %938 = vmatmul.mubr.bf16.vlgmr.msra.gmra.mrb[16].mxu1 %v1669_v11 }
 0x136   : > { %947 = vmatprep.mubr.bf16.mxu1 %v1757_v6 }
 0x13d   : > { %948 = vmatmul.mubr.bf16.gmra.mrb[20].mxu1 %v1670_v43 }
 0x13e   : > { %957 = vmatprep.mubr.bf16.mxu1 %v1757_v6 }
 0x145   : > { %958 = vmatmul.mubr.bf16.gmra.mrb[24].mxu1 %v1671_v41 }
 0x146   : > { %967 = vmatprep.mubr.bf16.mxu1 %v1757_v6 }
 0x14d   : > { %968 = vmatmul.mubr.bf16.gmra.mrb[28].mxu1 %v1672_v13 }
 0x14e   : > { %977 = vmatprep.mubr.bf16.mxu1 %v1757_v6 }
 0x155   : > { %978 = vmatmul.mubr.bf16.gmra.mrb[32].mxu1 %v1673_v15 }
 0x156   : > { %987 = vmatprep.mubr.bf16.mxu1 %v1757_v6 }
 0x15d   : > { %988 = vmatmul.mubr.bf16.gmra.mrb[36].mxu1 %v1674_v16 }
 0x15e   : > { %997 = vmatprep.mubr.bf16.mxu1 %v1757_v6 }
 0x165   : > { %998 = vmatmul.mubr.bf16.gmra.mrb[40].mxu1 %v1675_v17 }
 0x166   : > { %1007 = vmatprep.mubr.bf16.mxu1 %v1757_v6 }
 0x16d   : > { %1008 = vmatmul.mubr.bf16.gmra.mrb[44].mxu1 %v1676_v18 }
 0x16e   : > { %1430 = vmatprep.mubr.bf16.mxu1 %v1757_v6 }
 0x208   : > { %v939_v19 = vpop.f32.mrb[16].mxu1 }
 0x209   : > { %v940_v20 = vadd.f32 %v939_v19, %v780_v7  ;;  %v941_v21 = vpop.f32.mrb[17].mxu1 }
 0x20a   : > { %v942_v23 = vadd.f32 %v941_v21, %v780_v7  ;;  %v943_v24 = vpop.f32.mrb[18].mxu1  ;;  %v820_v7 = vpop.permute.xlu0 %819 }
 0x20b   : > { %v944_v25 = vadd.f32 %v943_v24, %v785_v22  ;;  %v945_v26 = vpop.f32.mrb[19].mxu1  ;;  %v1018_v28 = vmax.f32 %v940_v20, 0.0 }
 0x20c   : > { %v946_v27 = vadd.f32 %v945_v26, %v785_v22  ;;  %v1019_v30 = vmax.f32 %v942_v23, 0.0  ;;  %v825_v23 = vpop.permute.xlu1 %824 }
 0x20d   : > { %v1020_v29 = vmax.f32 %v944_v25, 0.0 }
 0x20e   : > { %v1021_v31 = vmax.f32 %v946_v27, 0.0 }
 0x20f   : > { %v1066_v32 = vpack.c.bf16 %v1020_v29, %v1018_v28 }
 0x210   : > { %v1067_v34 = vpack.c.bf16 %v1021_v31, %v1019_v30  ;;  %v949_v35 = vpop.f32.mrb[20].mxu1 }
 0x211   : > { %v950_v36 = vadd.f32 %v949_v35, %v790_v33  ;;  %v951_v8 = vpop.f32.mrb[21].mxu1 }
 0x212   : > { %v952_v38 = vadd.f32 %v951_v8, %v790_v33  ;;  %v953_v39 = vpop.f32.mrb[22].mxu1  ;;  %1226 = vmatprep.subr.bf16.mxu0 %v1067_v34  ;;  %v830_v34 = vpop.permute.xlu0 %829 }
 0x213   : > { %v954_v40 = vadd.f32 %v953_v39, %v795_v37  ;;  %v955_v42 = vpop.f32.mrb[23].mxu1  ;;  %1227 = vmatpush1.bf16.msra.mxu0 %v1066_v32  ;;  %v1022_v45 = vmax.f32 %v950_v36, 0.0 }
 0x214   : > { %v956_v44 = vadd.f32 %v955_v42, %v795_v37  ;;  %v1023_v47 = vmax.f32 %v952_v38, 0.0  ;;  %v835_v38 = vpop.permute.xlu1 %834 }
 0x215   : > { %v1024_v46 = vmax.f32 %v954_v40, 0.0 }
 0x216   : > { %v1025_v48 = vmax.f32 %v956_v44, 0.0 }
 0x217   : > { %v1068_v9 = vpack.c.bf16 %v1024_v46, %v1022_v45 }
 0x218   : > { %v1069_v50 = vpack.c.bf16 %v1025_v48, %v1023_v47  ;;  %v959_v51 = vpop.f32.mrb[24].mxu1 }
 0x219   : > { %v960_v52 = vadd.f32 %v959_v51, %v800_v49  ;;  %v961_v53 = vpop.f32.mrb[25].mxu1 }
 0x21a   : > { %v962_v55 = vadd.f32 %v961_v53, %v800_v49  ;;  %v963_v56 = vpop.f32.mrb[26].mxu1  ;;  %1228 = vmatprep.subr.bf16.mxu0 %v1069_v50  ;;  %v840_v50 = vpop.permute.xlu0 %839 }
 0x21b   : > { %v964_v57 = vadd.f32 %v963_v56, %v805_v54  ;;  %v965_v58 = vpop.f32.mrb[27].mxu1  ;;  %1229 = vmatpush1.bf16.msra.mxu0 %v1068_v9  ;;  %v1026_v60 = vmax.f32 %v960_v52, 0.0 }
 0x21c   : > { %v966_v59 = vadd.f32 %v965_v58, %v805_v54  ;;  %v1027_v62 = vmax.f32 %v962_v55, 0.0  ;;  %v845_v55 = vpop.permute.xlu1 %844 }
 0x21d   : > { %v1028_v61 = vmax.f32 %v964_v57, 0.0 }
 0x21e   : > { %v1029_v63 = vmax.f32 %v966_v59, 0.0 }
 0x21f   : > { %v1070_v0 = vpack.c.bf16 %v1028_v61, %v1026_v60 }
 0x220   : > { %v1071_v2 = vpack.c.bf16 %v1029_v63, %v1027_v62  ;;  %v969_v10 = vpop.f32.mrb[28].mxu1 }
 0x221   : > { %v970_v3 = vadd.f32 %v969_v10, %v810_v1  ;;  %v971_v4 = vpop.f32.mrb[29].mxu1 }
 0x222   : > { %v972_v12 = vadd.f32 %v971_v4, %v810_v1  ;;  %v973_v14 = vpop.f32.mrb[30].mxu1  ;;  %1230 = vmatprep.subr.bf16.mxu0 %v1071_v2  ;;  %v850_v2 = vpop.permute.xlu0 %849 }
 0x223   : > { %v974_v11 = vadd.f32 %v973_v14, %v815_v5  ;;  %v975_v43 = vpop.f32.mrb[31].mxu1  ;;  %1231 = vmatpush1.bf16.msra.mxu0 %v1070_v0  ;;  %v1030_v13 = vmax.f32 %v970_v3, 0.0 }
 0x224   : > { %v976_v41 = vadd.f32 %v975_v43, %v815_v5  ;;  %v1031_v16 = vmax.f32 %v972_v12, 0.0  ;;  %v855_v12 = vpop.permute.xlu1 %854 }
 0x225   : > { %v1032_v15 = vmax.f32 %v974_v11, 0.0 }
 0x226   : > { %v1033_v17 = vmax.f32 %v976_v41, 0.0 }
 0x227   : > { %v1072_v18 = vpack.c.bf16 %v1032_v15, %v1030_v13 }
 0x228   : > { %v1073_v19 = vpack.c.bf16 %v1033_v17, %v1031_v16  ;;  %v979_v20 = vpop.f32.mrb[32].mxu1 }
 0x229   : > { %v980_v21 = vadd.f32 %v979_v20, %v820_v7  ;;  %v981_v22 = vpop.f32.mrb[33].mxu1  ;;  %v1677_v20 = vld [vmem:[%s2210_s5] sm:$0xff]  }
 0x22a   : > { %v982_v24 = vadd.f32 %v981_v22, %v820_v7  ;;  %v983_v25 = vpop.f32.mrb[34].mxu1  ;;  %1232 = vmatprep.subr.bf16.mxu0 %v1073_v19  ;;  %v1679_v22 = vld [vmem:[%s2210_s5 + $0x10] sm:$0xff]  }
 0x22b   : > { %v984_v26 = vadd.f32 %v983_v25, %v825_v23  ;;  %v985_v27 = vpop.f32.mrb[35].mxu1  ;;  %1233 = vmatpush1.bf16.msra.mxu0 %v1072_v18  ;;  %v1034_v29 = vmax.f32 %v980_v21, 0.0  ;;  %v1678_v21 = vld [vmem:[%s2210_s5 + $0x8] sm:$0xff]  }
 0x22c   : > { %v986_v28 = vadd.f32 %v985_v27, %v825_v23  ;;  %v1035_v31 = vmax.f32 %v982_v24, 0.0  ;;  %v1680_v23 = vld [vmem:[%s2210_s5 + $0x18] sm:$0xff]   ;;  %v1681_v24 = vld [vmem:[%s2210_s5 + $0x20] sm:$0xff]   ;;  %v1682_v25 = vld [vmem:[%s2210_s5 + $0x28] sm:$0xff]  }
 0x22d   : > { %v1036_v30 = vmax.f32 %v984_v26, 0.0  ;;  %v1683_v26 = vld [vmem:[%s2210_s5 + $0x30] sm:$0xff]   ;;  %v1684_v27 = vld [vmem:[%s2210_s5 + $0x38] sm:$0xff]  }
 0x22e   : > { %v1037_v32 = vmax.f32 %v986_v28, 0.0  ;;  %v1101_v28 = vpop.permute.xlu0 %1100 }
 0x22f   : > { %v1074_v33 = vpack.c.bf16 %v1036_v30, %v1034_v29 }
 0x230   : > { %v1075_v35 = vpack.c.bf16 %v1037_v32, %v1035_v31  ;;  %v989_v36 = vpop.f32.mrb[36].mxu1  ;;  %v1106_v32 = vpop.permute.xlu1 %1105 }
 0x231   : > { %v990_v8 = vadd.f32 %v989_v36, %v830_v34  ;;  %v991_v37 = vpop.f32.mrb[37].mxu1 }
 0x232   : > { %v992_v39 = vadd.f32 %v991_v37, %v830_v34  ;;  %v993_v40 = vpop.f32.mrb[38].mxu1  ;;  %1234 = vmatprep.subr.bf16.mxu0 %v1075_v35 }
 0x233   : > { %v994_v42 = vadd.f32 %v993_v40, %v835_v38  ;;  %v995_v44 = vpop.f32.mrb[39].mxu1  ;;  %1235 = vmatpush1.bf16.msra.mxu0 %v1074_v33  ;;  %v1038_v46 = vmax.f32 %v990_v8, 0.0 }
 0x234   : > { %v996_v45 = vadd.f32 %v995_v44, %v835_v38  ;;  %v1039_v48 = vmax.f32 %v992_v39, 0.0 }
 0x235   : > { %v1040_v47 = vmax.f32 %v994_v42, 0.0  ;;  %v1111_v42 = vpop.permute.xlu0 %1110 }
 0x236   : > { %v1041_v9 = vmax.f32 %v996_v45, 0.0 }
 0x237   : > { %v1076_v49 = vpack.c.bf16 %v1040_v47, %v1038_v46 }
 0x238   : > { %v1077_v51 = vpack.c.bf16 %v1041_v9, %v1039_v48  ;;  %v999_v52 = vpop.f32.mrb[40].mxu1  ;;  %v1116_v48 = vpop.permute.xlu1 %1115 }
 0x239   : > { %v1000_v53 = vadd.f32 %v999_v52, %v840_v50  ;;  %v1001_v54 = vpop.f32.mrb[41].mxu1 }
 0x23a   : > { %v1002_v56 = vadd.f32 %v1001_v54, %v840_v50  ;;  %v1003_v57 = vpop.f32.mrb[42].mxu1  ;;  %1236 = vmatprep.subr.bf16.mxu0 %v1077_v51 }
 0x23b   : > { %v1004_v58 = vadd.f32 %v1003_v57, %v845_v55  ;;  %v1005_v59 = vpop.f32.mrb[43].mxu1  ;;  %1237 = vmatpush1.bf16.msra.mxu0 %v1076_v49  ;;  %v1042_v61 = vmax.f32 %v1000_v53, 0.0 }
 0x23c   : > { %v1006_v60 = vadd.f32 %v1005_v59, %v845_v55  ;;  %v1043_v63 = vmax.f32 %v1002_v56, 0.0 }
 0x23d   : > { %v1044_v62 = vmax.f32 %v1004_v58, 0.0  ;;  %v1121_v58 = vpop.permute.xlu0 %1120 }
 0x23e   : > { %v1045_v0 = vmax.f32 %v1006_v60, 0.0 }
 0x23f   : > { %v1078_v1 = vpack.c.bf16 %v1044_v62, %v1042_v61 }
 0x240   : > { %v1079_v10 = vpack.c.bf16 %v1045_v0, %v1043_v63  ;;  %v1009_v3 = vpop.f32.mrb[44].mxu1  ;;  %v1126_v63 = vpop.permute.xlu1 %1125 }
 0x241   : > { %v1010_v4 = vadd.f32 %v1009_v3, %v850_v2  ;;  %v1011_v5 = vpop.f32.mrb[45].mxu1 }
 0x242   : > { %v1012_v14 = vadd.f32 %v1011_v5, %v850_v2  ;;  %v1013_v11 = vpop.f32.mrb[46].mxu1  ;;  %1238 = vmatprep.subr.bf16.mxu0 %v1079_v10 }
 0x243   : > { %v1014_v43 = vadd.f32 %v1013_v11, %v855_v12  ;;  %v1015_v41 = vpop.f32.mrb[47].mxu1  ;;  %1239 = vmatpush1.bf16.msra.mxu0 %v1078_v1  ;;  %v1046_v15 = vmax.f32 %v1010_v4, 0.0 }
 0x244   : > { %v1016_v13 = vadd.f32 %v1015_v41, %v855_v12  ;;  %v1047_v17 = vmax.f32 %v1012_v14, 0.0 }
 0x245   : > { %v1048_v16 = vmax.f32 %v1014_v43, 0.0  ;;  %v1131_v43 = vpop.permute.xlu0 %1130 }
 0x246   : > { %v1049_v18 = vmax.f32 %v1016_v13, 0.0 }
 0x247   : > { %v1080_v7 = vpack.c.bf16 %v1048_v16, %v1046_v15 }
 0x248   : > { %v1081_v19 = vpack.c.bf16 %v1049_v18, %v1047_v17  ;;  %v1136_v17 = vpop.permute.xlu1 %1135 }
 0x24a   : > { %1240 = vmatprep.subr.bf16.mxu0 %v1081_v19 }
 0x24b   : > { %1241 = vmatpush1.bf16.msra.mxu0 %v1080_v7 }
 0x24e   : > { %1259 = vmatmul.mubr.bf16.vlgmr.msra.gmra.mrb[16].mxu0 %v1677_v20 }
 0x24f   : > { %1268 = vmatprep.mubr.bf16.mxu0 %v1757_v6 }
 0x256   : > { %1269 = vmatmul.mubr.bf16.gmra.mrb[20].mxu0 %v1678_v21 }
 0x257   : > { %1278 = vmatprep.mubr.bf16.mxu0 %v1757_v6 }
 0x25e   : > { %1279 = vmatmul.mubr.bf16.gmra.mrb[24].mxu0 %v1679_v22 }
 0x25f   : > { %1288 = vmatprep.mubr.bf16.mxu0 %v1757_v6 }
 0x266   : > { %1289 = vmatmul.mubr.bf16.gmra.mrb[28].mxu0 %v1680_v23 }
 0x267   : > { %1298 = vmatprep.mubr.bf16.mxu0 %v1757_v6 }
 0x26e   : > { %1299 = vmatmul.mubr.bf16.gmra.mrb[32].mxu0 %v1681_v24 }
 0x26f   : > { %1308 = vmatprep.mubr.bf16.mxu0 %v1757_v6 }
 0x276   : > { %1309 = vmatmul.mubr.bf16.gmra.mrb[36].mxu0 %v1682_v25 }
 0x277   : > { %1318 = vmatprep.mubr.bf16.mxu0 %v1757_v6 }
 0x27e   : > { %1319 = vmatmul.mubr.bf16.gmra.mrb[40].mxu0 %v1683_v26 }
 0x27f   : > { %1328 = vmatprep.mubr.bf16.mxu0 %v1757_v6 }
 0x286   : > { %1329 = vmatmul.mubr.bf16.gmra.mrb[44].mxu0 %v1684_v27  ;;  %v1141_v27 = vpop.permute.xlu0 %1140 }
 0x321   : > { %v1260_v29 = vpop.f32.mrb[16].mxu0 }
 0x322   : > { %v1261_v30 = vadd.f32 %v1260_v29, %v1101_v28  ;;  %v1262_v31 = vpop.f32.mrb[17].mxu0 }
 0x323   : > { %v1263_v33 = vadd.f32 %v1262_v31, %v1101_v28  ;;  %v1264_v34 = vpop.f32.mrb[18].mxu0 }
 0x324   : > { %v1265_v35 = vadd.f32 %v1264_v34, %v1106_v32  ;;  %v1266_v36 = vpop.f32.mrb[19].mxu0  ;;  %v1339_v37 = vmax.f32 %v1261_v30, 0.0 }
 0x325   : > { %v1267_v8 = vadd.f32 %v1266_v36, %v1106_v32  ;;  %v1340_v39 = vmax.f32 %v1263_v33, 0.0  ;;  %v1146_v32 = vpop.permute.xlu1 %1145 }
 0x326   : > { %v1341_v38 = vmax.f32 %v1265_v35, 0.0 }
 0x327   : > { %v1342_v40 = vmax.f32 %v1267_v8, 0.0 }
 0x328   : > { %v1372_v6 = vpack.c.bf16 %v1341_v38, %v1339_v37 }
 0x329   : > { %v1373_v44 = vpack.c.bf16 %v1342_v40, %v1340_v39  ;;  %v1270_v45 = vpop.f32.mrb[20].mxu0 }
 0x32a   : > { %v1271_v46 = vadd.f32 %v1270_v45, %v1111_v42  ;;  %v1272_v47 = vpop.f32.mrb[21].mxu0 }
 0x32b   : > { %v1273_v9 = vadd.f32 %v1272_v47, %v1111_v42  ;;  %v1274_v49 = vpop.f32.mrb[22].mxu0  ;;  %1398 = vmatprep.subr.bf16.mxu1 %v1373_v44  ;;  %v1151_v42 = vpop.permute.xlu0 %1150 }
 0x32c   : > { %v1275_v50 = vadd.f32 %v1274_v49, %v1116_v48  ;;  %v1276_v51 = vpop.f32.mrb[23].mxu0  ;;  %1399 = vmatpush1.bf16.msra.mxu1 %v1372_v6  ;;  %v1343_v53 = vmax.f32 %v1271_v46, 0.0 }
 0x32d   : > { %v1277_v52 = vadd.f32 %v1276_v51, %v1116_v48  ;;  %v1344_v55 = vmax.f32 %v1273_v9, 0.0  ;;  %v1156_v48 = vpop.permute.xlu1 %1155 }
 0x32e   : > { %v1345_v54 = vmax.f32 %v1275_v50, 0.0 }
 0x32f   : > { %v1346_v56 = vmax.f32 %v1277_v52, 0.0 }
 0x330   : > { %v1374_v57 = vpack.c.bf16 %v1345_v54, %v1343_v53 }
 0x331   : > { %v1375_v59 = vpack.c.bf16 %v1346_v56, %v1344_v55  ;;  %v1280_v60 = vpop.f32.mrb[24].mxu0 }
 0x332   : > { %v1281_v61 = vadd.f32 %v1280_v60, %v1121_v58  ;;  %v1282_v62 = vpop.f32.mrb[25].mxu0 }
 0x333   : > { %v1283_v0 = vadd.f32 %v1282_v62, %v1121_v58  ;;  %v1284_v1 = vpop.f32.mrb[26].mxu0  ;;  %1400 = vmatprep.subr.bf16.mxu1 %v1375_v59  ;;  %v1161_v58 = vpop.permute.xlu0 %1160 }
 0x334   : > { %v1285_v2 = vadd.f32 %v1284_v1, %v1126_v63  ;;  %v1286_v10 = vpop.f32.mrb[27].mxu0  ;;  %1401 = vmatpush1.bf16.msra.mxu1 %v1374_v57  ;;  %v1347_v4 = vmax.f32 %v1281_v61, 0.0 }
 0x335   : > { %v1287_v3 = vadd.f32 %v1286_v10, %v1126_v63  ;;  %v1348_v12 = vmax.f32 %v1283_v0, 0.0  ;;  %v1166_v63 = vpop.permute.xlu1 %1165 }
 0x336   : > { %v1349_v5 = vmax.f32 %v1285_v2, 0.0 }
 0x337   : > { %v1350_v14 = vmax.f32 %v1287_v3, 0.0 }
 0x338   : > { %v1376_v11 = vpack.c.bf16 %v1349_v5, %v1347_v4 }
 0x339   : > { %v1377_v41 = vpack.c.bf16 %v1350_v14, %v1348_v12  ;;  %v1290_v13 = vpop.f32.mrb[28].mxu0 }
 0x33a   : > { %v1291_v15 = vadd.f32 %v1290_v13, %v1131_v43  ;;  %v1292_v16 = vpop.f32.mrb[29].mxu0 }
 0x33b   : > { %v1293_v18 = vadd.f32 %v1292_v16, %v1131_v43  ;;  %v1294_v7 = vpop.f32.mrb[30].mxu0  ;;  %1402 = vmatprep.subr.bf16.mxu1 %v1377_v41  ;;  %v1171_v43 = vpop.permute.xlu0 %1170 }
 0x33c   : > { %v1295_v19 = vadd.f32 %v1294_v7, %v1136_v17  ;;  %v1296_v20 = vpop.f32.mrb[31].mxu0  ;;  %1403 = vmatpush1.bf16.msra.mxu1 %v1376_v11  ;;  %v1351_v22 = vmax.f32 %v1291_v15, 0.0 }
 0x33d   : > { %v1297_v21 = vadd.f32 %v1296_v20, %v1136_v17  ;;  %v1352_v24 = vmax.f32 %v1293_v18, 0.0  ;;  %v1176_v17 = vpop.permute.xlu1 %1175 }
 0x33e   : > { %v1353_v23 = vmax.f32 %v1295_v19, 0.0 }
 0x33f   : > { %v1354_v25 = vmax.f32 %v1297_v21, 0.0 }
 0x340   : > { %v1378_v26 = vpack.c.bf16 %v1353_v23, %v1351_v22 }
 0x341   : > { %v1379_v28 = vpack.c.bf16 %v1354_v25, %v1352_v24  ;;  %v1300_v29 = vpop.f32.mrb[32].mxu0 }
 0x342   : > { %v1301_v30 = vadd.f32 %v1300_v29, %v1141_v27  ;;  %v1302_v31 = vpop.f32.mrb[33].mxu0  ;;  %v1394_v29 = vlaneseq }
 0x343   : > { %v1303_v33 = vadd.f32 %v1302_v31, %v1141_v27  ;;  %v1304_v34 = vpop.f32.mrb[34].mxu0  ;;  %1404 = vmatprep.subr.bf16.mxu1 %v1379_v28  ;;  %v1371_v28 = vld [vmem:[%s2212_s7] sm:$0x1] }
 0x344   : > { %v1305_v35 = vadd.f32 %v1304_v34, %v1146_v32  ;;  %v1306_v36 = vpop.f32.mrb[35].mxu0  ;;  %1405 = vmatpush1.bf16.msra.mxu1 %v1378_v26  ;;  %v1355_v37 = vmax.f32 %v1301_v30, 0.0  ;;  %v1395_v30 = vshrl.u32 %v1394_v29, 7  ;;  %vm1471_vm1 = vcmp.lt.s32.totalorder %v1394_v29, 256 }
 0x345   : > { %v1307_v8 = vadd.f32 %v1306_v36, %v1146_v32  ;;  %v1356_v39 = vmax.f32 %v1303_v33, 0.0  ;;  %v1392_v32 = vpop.permute.xlu0 %1391 }
 0x346   : > { %v1357_v38 = vmax.f32 %v1305_v35, 0.0  ;;  %v1396_v31 = vsub.s32 0, %v1395_v30 }
 0x347   : > { %v1358_v40 = vmax.f32 %v1307_v8, 0.0 }
 0x348   : > { %v1380_v6 = vpack.c.bf16 %v1357_v38, %v1355_v37  ;;  %v1397_v33 = vrot.slane %v1392_v32, %v1396_v31 }
 0x349   : > { %v1381_v44 = vpack.c.bf16 %v1358_v40, %v1356_v39  ;;  %v1310_v45 = vpop.f32.mrb[36].mxu0 }
 0x34a   : > { %v1311_v46 = vadd.f32 %v1310_v45, %v1151_v42  ;;  %v1312_v47 = vpop.f32.mrb[37].mxu0 }
 0x34b   : > { %v1313_v9 = vadd.f32 %v1312_v47, %v1151_v42  ;;  %v1314_v49 = vpop.f32.mrb[38].mxu0  ;;  %1406 = vmatprep.subr.bf16.mxu1 %v1381_v44 }
 0x34c   : > { %v1315_v50 = vadd.f32 %v1314_v49, %v1156_v48  ;;  %v1316_v51 = vpop.f32.mrb[39].mxu0  ;;  %1407 = vmatpush1.bf16.msra.mxu1 %v1380_v6  ;;  %v1359_v53 = vmax.f32 %v1311_v46, 0.0  ;;  %v1758_v46 = vmov 1966171168  }
 0x34d   : > { %v1317_v52 = vadd.f32 %v1316_v51, %v1156_v48  ;;  %v1360_v55 = vmax.f32 %v1313_v9, 0.0  ;;  %v1455_v47 = vunpack.c.l.s4 %v1758_v46 }
 0x34e   : > { %v1361_v54 = vmax.f32 %v1315_v50, 0.0 }
 0x34f   : > { %v1362_v56 = vmax.f32 %v1317_v52, 0.0  ;;  %v1456_v48 = vunpack.c.0.s8 %v1455_v47 }
 0x350   : > { %v1382_v57 = vpack.c.bf16 %v1361_v54, %v1359_v53 }
 0x351   : > { %v1383_v59 = vpack.c.bf16 %v1362_v56, %v1360_v55  ;;  %v1320_v60 = vpop.f32.mrb[40].mxu0  ;;  %v1459_v49 = vsub.s32 %v1456_v48, %v1395_v30 }
 0x352   : > { %v1321_v61 = vadd.f32 %v1320_v60, %v1161_v58  ;;  %v1322_v62 = vpop.f32.mrb[41].mxu0 }
 0x353   : > { %v1323_v0 = vadd.f32 %v1322_v62, %v1161_v58  ;;  %v1324_v1 = vpop.f32.mrb[42].mxu0  ;;  %1408 = vmatprep.subr.bf16.mxu1 %v1383_v59 }
 0x354   : > { %v1325_v2 = vadd.f32 %v1324_v1, %v1166_v63  ;;  %v1326_v10 = vpop.f32.mrb[43].mxu0  ;;  %1409 = vmatpush1.bf16.msra.mxu1 %v1382_v57  ;;  %v1363_v4 = vmax.f32 %v1321_v61, 0.0 }
 0x355   : > { %v1327_v3 = vadd.f32 %v1326_v10, %v1166_v63  ;;  %v1364_v12 = vmax.f32 %v1323_v0, 0.0 }
 0x356   : > { %v1365_v5 = vmax.f32 %v1325_v2, 0.0 }
 0x357   : > { %v1366_v14 = vmax.f32 %v1327_v3, 0.0 }
 0x358   : > { %v1384_v11 = vpack.c.bf16 %v1365_v5, %v1363_v4 }
 0x359   : > { %v1385_v41 = vpack.c.bf16 %v1366_v14, %v1364_v12  ;;  %v1330_v13 = vpop.f32.mrb[44].mxu0 }
 0x35a   : > { %v1331_v15 = vadd.f32 %v1330_v13, %v1171_v43  ;;  %v1332_v16 = vpop.f32.mrb[45].mxu0 }
 0x35b   : > { %v1333_v18 = vadd.f32 %v1332_v16, %v1171_v43  ;;  %v1334_v7 = vpop.f32.mrb[46].mxu0  ;;  %1410 = vmatprep.subr.bf16.mxu1 %v1385_v41 }
 0x35c   : > { %v1335_v19 = vadd.f32 %v1334_v7, %v1176_v17  ;;  %v1336_v20 = vpop.f32.mrb[47].mxu0  ;;  %1411 = vmatpush1.bf16.msra.mxu1 %v1384_v11  ;;  %v1367_v22 = vmax.f32 %v1331_v15, 0.0 }
 0x35d   : > { %v1337_v21 = vadd.f32 %v1336_v20, %v1176_v17  ;;  %v1368_v24 = vmax.f32 %v1333_v18, 0.0 }
 0x35e   : > { %v1369_v23 = vmax.f32 %v1335_v19, 0.0 }
 0x35f   : > { %v1370_v25 = vmax.f32 %v1337_v21, 0.0 }
 0x360   : > { %v1386_v26 = vpack.c.bf16 %v1369_v23, %v1367_v22 }
 0x361   : > { %v1387_v27 = vpack.c.bf16 %v1370_v25, %v1368_v24 }
 0x363   : > { %1412 = vmatprep.subr.bf16.mxu1 %v1387_v27 }
 0x364   : > { %1413 = vmatpush1.bf16.msra.mxu1 %v1386_v26 }
 0x367   : > { %1431 = vmatmul.mubr.bf16.vlgmr.msra.gmra.mrb[48].mxu1 %v1371_v28 }
 0x43a   : > { %v1432_v34 = vpop.f32.mrb[48].mxu1 }
 0x43b   : > { %v1433_v35 = vadd.f32 %v1432_v34, %v1397_v33  ;;  %v1434_v36 = vpop.f32.mrb[49].mxu1 }
 0x43c   : > { %v1435_v8 = vadd.f32 %v1434_v36, %v1397_v33  ;;  %v1436_v37 = vpop.f32.mrb[50].mxu1 }
 0x43d   : > { %v1599_v38 = vmul.f32 -1.442695, %v1433_v35  ;;  %v1437_v39 = vpop.f32.mrb[51].mxu1 }
 0x43e   : > { %v1600_v40 = vmul.f32 -1.442695, %v1435_v8 }
 0x43f   : > { %1685 = vpow2.f32 %v1599_v38 }
 0x440   : > { %1687 = vpow2.f32 %v1600_v40 }
 0x449   : > { %v1686_v6 = vpop.eup %1685 }
 0x44a   : > { %v1688_v42 = vpop.eup %1687  ;;  %v1445_v44 = vadd.f32 1.0, %v1686_v6 }
 0x44b   : > { %v1446_v45 = vadd.f32 1.0, %v1688_v42 }
 0x44c   : > { %1689 = vrcp.f32 %v1445_v44 }
 0x44d   : > { %1691 = vrcp.f32 %v1446_v45 }
 0x456   : > { %v1690_v9 = vpop.eup %1689 }
 0x457   : > { %v1692_v50 = vpop.eup %1691 }
 0x458   : > { %v1453_v51 = vcombine.low %v1690_v9, %v1692_v50 }
 0x45a   : > { %v1460_v52 = vrot.slane %v1453_v51, %v1459_v49 }
 0x45c   : > { %v1467_v53 = vrot.slane %v1460_v52, %v1459_v49 }
 0x45e   : > { %1473 = vst.msk [vmem:[%s379_s23] sm:$0x3] %vm1471_vm1, %v1467_v53 }
 0x45f   : > { %1706 = shalt.err (!%p1703_p5)
}
 0x460   : > { %s1707_s29 = scalar_lea.hbm %s2161_s27, 32  ;;  %s1711_s22 = scalar_lea.hbm %s2214_s9, 64 }
 0x461   : > { %p1708_p7 = scmp.ne.s32.totalorder %s2161_s27, %s1707_s29  ;;  %p1712_p12 = scmp.lt.u32.totalorder %s2161_s27, %s2214_s9 }
 0x462   : > { %p1713_p13 = scmp.lt.u32.totalorder %s1711_s22, %s1707_s29  ;;  %p1715_p1 = scmp.lt.u32.totalorder %s1707_s29, %s2161_s27 }
 0x463   : > { %p1709_p10 = pnand %p1708_p7, %p1851_p6 }
 0x464   : > { %p1714_p0 = por %p1713_p13, %p1712_p12 }
 0x465   : > { %p1710_p11 = pneg %p1709_p10 }
 0x466   : > { %p1716_p2 = por %p1715_p1, %p1714_p0 }
 0x468   : > { %p1717_p3 = pnand %p1716_p2, %p1710_p11 }
 0x46a   : > { %1720 = shalt.err (!%p1717_p3)
}
 0x46b   : > { %1612 = dma.vmem_to_hbm [thread:$0]  (%p1851_p6), %s2163_s24, 32, %s2161_s27, %s1475_s28  }
 0x46c PF: > { %s1501_s26 = sand.u32 1, %s1743_s11   ;;  %p1615_p4 = pnand %p1556_p9, %p1855_p8 }
 0x46d   : > { %s1502_s30 = scalar_lea.sflag [#allocation5], %s1501_s26 }
 0x46e   : > { %1738 = dma.done.wait (!%p1615_p4), %s1502_s30, 32  }
 0x46f   : > { %1740 = vsyncadd (!%p1615_p4), %s1502_s30, 4294967264  ;;  %p21_p5 = scmp.ge.s32.totalorder %s1836_s16, 4   ;;  %s2217_s11 = smov %s1747_s12 }
 0x470   : > { %s2218_s12 = smov %s1751_s13  ;;  %s2219_s13 = smov %s1849_s19 }
 0x471   : > { %s2220_s14 = smov %s1836_s16  ;;  %23 = sbr.rel (!%p21_p5) target bundleno = 6 (0x6), region = 134 }
 0x478   :  { %1507 = vsyncpa [#allocation5], 1 }
 0x479   :  { %1509 = vsyncpa [#allocation5 + $0x1], 1 }

</bundles_post_ra>
